<compile_context>
chip_gen: v7x
topology: tpu7x:2x2x1
jax: 0.10.0
libtpu: 0.0.40
codegen_flags: <defaults>
</compile_context>

<pallas_src>
import jax
import jax.numpy as jnp
from jax.experimental import pallas as pl
from jax.experimental.pallas import tpu as pltpu

_MiB = 1024 * 1024
_LANE = 128


def _normalize_kernel(x_ref, scale_ref, bias_ref, out_ref):
    # x_ref / out_ref   : (row_block, col_block) VMEM tiles (image dtype).
    # scale_ref/bias_ref: (row_block, 1) per-row f32 constants, lane-broadcast.
    x = x_ref[...].astype(jnp.float32)
    out_ref[...] = (x * scale_ref[...] + bias_ref[...]).astype(out_ref.dtype)


def _per_generation_tuning():
    """(target_block_bytes, vmem_limit_bytes) chosen from the TPU generation."""
    try:
        info = pltpu.get_tpu_info()
        vmem_phys = int(getattr(info, "vmem_capacity_bytes", 128 * _MiB))
    except Exception:  # CPU interpret / unknown platform: safe defaults.
        vmem_phys = 128 * _MiB
    if vmem_phys <= 64 * _MiB:
        # v7x-class: 64 MiB physical VMEM, ~3.2 TB/s HBM.  Bigger blocks to
        # amortize the ~0.35us/step overhead; explicit scoped limit with
        # headroom below the physical 64 MiB (4 bufs x 6 MiB = 24 MiB).
        return 6 * _MiB, 44 * _MiB
    # v5e / v6e: 128 MiB physical.  4 MiB blocks (4 bufs x 4 MiB = 16 MiB)
    # with a modest explicit limit so v5e's 16 MiB default is not a problem.
    return 4 * _MiB, 32 * _MiB


def normalization(img, mean, std, *, target_block_bytes=None, vmem_limit_bytes=None):
    """Equivalent of (img - mean[:,None,None]) / std[:,None,None] for NCHW img."""
    N, C, H, W = img.shape
    dtype = img.dtype
    itemsize = jnp.dtype(dtype).itemsize

    auto_block, auto_vmem = _per_generation_tuning()
    if target_block_bytes is None:
        target_block_bytes = auto_block
    if vmem_limit_bytes is None:
        vmem_limit_bytes = auto_vmem

    mean = jnp.asarray(mean, dtype=jnp.float32).reshape(-1)
    std = jnp.asarray(std, dtype=jnp.float32).reshape(-1)
    assert mean.shape == (C,) and std.shape == (C,)

    # Fold the per-channel divide into a multiply-add.  Keep f32 precision;
    # the kernel upcasts the image, FMAs in f32 and casts only on the store.
    scale = 1.0 / std
    bias = -mean / std

    # Lane-dense flattening: (N, C, H, W) -> (N*C, H*W) is free for row-major
    # NCHW.  Per-row scale/bias repeat the per-channel constants across N.
    rows, cols = N * C, H * W
    x2d = img.reshape(rows, cols)
    scale2d = jnp.tile(scale, N).reshape(rows, 1)
    bias2d = jnp.tile(bias, N).reshape(rows, 1)

    # ---- Block sizing ----------------------------------------------------
    # Native sublane packing granularity per dtype: f32 -> 8, bf16 -> 16,
    # int8/fp8 -> 32 rows.  Keeps loads/stores unmasked and avoids relayout.
    sublane_gran = {4: 8, 2: 16, 1: 32}.get(itemsize, 8)

    # Column block: sized assuming the minimum sublane-granularity row block,
    # so a single block can never exceed the target even for huge H*W.  A
    # 128-multiple col_block with a masked partial tail block is legal, so we
    # never fall back to an unbounded "full width" block.
    col_cap = (target_block_bytes // (sublane_gran * itemsize)) // _LANE * _LANE
    col_cap = max(_LANE, col_cap)
    col_block = min(cols, col_cap)  # == cols (full dim) when the row fits.

    # Row block: multiple of the dtype granularity (or the full row count),
    # sized so row_block * col_block * itemsize ~= target_block_bytes.
    rows_fit = max(sublane_gran, target_block_bytes // max(1, col_block * itemsize))
    if rows <= sublane_gran or rows_fit >= rows:
        row_block = rows
    else:
        row_block = max(sublane_gran, (min(rows_fit, rows) // sublane_gran) * sublane_gran)

    grid = (pl.cdiv(rows, row_block), pl.cdiv(cols, col_block))

    out2d = pl.pallas_call(
        _normalize_kernel,
        out_shape=jax.ShapeDtypeStruct((rows, cols), dtype),
        grid_spec=pltpu.PrefetchScalarGridSpec(
            num_scalar_prefetch=0,
            grid=grid,
            in_specs=[
                pl.BlockSpec((row_block, col_block), lambda i, j: (i, j)),
                pl.BlockSpec((row_block, 1), lambda i, j: (i, 0)),
                pl.BlockSpec((row_block, 1), lambda i, j: (i, 0)),
            ],
            out_specs=pl.BlockSpec((row_block, col_block), lambda i, j: (i, j)),
        ),
        compiler_params=pltpu.CompilerParams(
            dimension_semantics=("parallel", "parallel"),
            vmem_limit_bytes=vmem_limit_bytes,
        ),
        # Note: input_output_aliases={0: 0} could donate x2d into the output
        # when the caller no longer needs `img`; left off so the input stays
        # valid for the reference check below.
    )(x2d, scale2d, bias2d)

    return out2d.reshape(N, C, H, W)


def _reference(img, mean, std):
    mean = jnp.asarray(mean, dtype=jnp.float32).reshape(-1, 1, 1)
    std = jnp.asarray(std, dtype=jnp.float32).reshape(-1, 1, 1)
    return (img - mean) / std


if __name__ == "__main__":
    # Deterministic parameters (ImageNet-style normalization constants).
    mean3 = jnp.array([0.485, 0.456, 0.406], dtype=jnp.float32)
    std3 = jnp.array([0.229, 0.224, 0.225], dtype=jnp.float32)

    key = jax.random.PRNGKey(0)
    k1, k2 = jax.random.split(key)

    # Case 1: small NCHW input, single-block path.
    img1 = jax.random.uniform(k1, (2, 3, 16, 16), dtype=jnp.float32)
    out1 = jax.block_until_ready(normalization(img1, mean3, std3))
    ref1 = _reference(img1, mean3, std3)
    assert out1.shape == img1.shape and out1.dtype == img1.dtype
    assert jnp.allclose(out1, ref1, atol=1e-5, rtol=1e-5)

    # Case 2: exercise the multi-block grid + masked column tail with a tiny
    # forced block budget (24x40 -> 960 cols, col_block 512 -> partial tail).
    mean4 = jnp.array([0.485, 0.456, 0.406, 0.5], dtype=jnp.float32)
    std4 = jnp.array([0.229, 0.224, 0.225, 0.25], dtype=jnp.float32)
    img2 = jax.random.uniform(k2, (2, 4, 24, 40), dtype=jnp.float32)
    out2 = jax.block_until_ready(
        normalization(img2, mean4, std4, target_block_bytes=16 * 1024)
    )
    ref2 = _reference(img2, mean4, std4)
    assert out2.shape == img2.shape and out2.dtype == img2.dtype
    assert jnp.allclose(out2, ref2, atol=1e-5, rtol=1e-5)

    print("KERNEL_OK")
</pallas_src>

<mosaic_0001>
module attributes {stable_mosaic.version = 11 : i64} {
  func.func @_normalize_kernel(%arg0: i32, %arg1: i32, %arg2: memref<6x256xf32, #tpu.memory_space<vmem>>, %arg3: memref<6x1xf32, #tpu.memory_space<vmem>>, %arg4: memref<6x1xf32, #tpu.memory_space<vmem>>, %arg5: memref<6x256xf32, #tpu.memory_space<vmem>>) attributes {dimension_semantics = [#tpu.dimension_semantics<parallel>, #tpu.dimension_semantics<parallel>], iteration_bounds = array<i64: 1, 1>, scalar_prefetch = 0 : i64, scratch_operands = 0 : i64, tpu.core_type = #tpu.core_type<tc>, window_params = [{transform_indices = @transform_0, window_bounds = array<i64: 6, 256>}, {transform_indices = @transform_1, window_bounds = array<i64: 6, 1>}, {transform_indices = @transform_2, window_bounds = array<i64: 6, 1>}, {transform_indices = @transform_3, window_bounds = array<i64: 6, 256>}]} {
    %c0 = arith.constant 0 : index
    %c0_0 = arith.constant 0 : index
    %0 = vector.load %arg2[%c0, %c0_0] : memref<6x256xf32, #tpu.memory_space<vmem>>, vector<6x256xf32>
    %c0_1 = arith.constant 0 : index
    %c0_2 = arith.constant 0 : index
    %1 = vector.load %arg3[%c0_1, %c0_2] : memref<6x1xf32, #tpu.memory_space<vmem>>, vector<6x1xf32>
    %2 = vector.broadcast %1 : vector<6x1xf32> to vector<6x256xf32>
    %3 = arith.mulf %0, %2 : vector<6x256xf32>
    %c0_3 = arith.constant 0 : index
    %c0_4 = arith.constant 0 : index
    %4 = vector.load %arg4[%c0_3, %c0_4] : memref<6x1xf32, #tpu.memory_space<vmem>>, vector<6x1xf32>
    %5 = vector.broadcast %4 : vector<6x1xf32> to vector<6x256xf32>
    %6 = arith.addf %3, %5 : vector<6x256xf32>
    %c0_5 = arith.constant 0 : index
    %c0_6 = arith.constant 0 : index
    %7 = vector.load %arg5[%c0_5, %c0_6] : memref<6x256xf32, #tpu.memory_space<vmem>>, vector<6x256xf32>
    tpu.vector_store %arg5[%c0_5, %c0_6], %6 {strides = array<i32>} : memref<6x256xf32, #tpu.memory_space<vmem>>, vector<6x256xf32>,
    return
  }
  func.func @transform_0(%arg0: i32, %arg1: i32) -> (i32, i32) {
    %c0_i32 = arith.constant 0 : i32
    return %arg0, %arg1 : i32, i32
  }
  func.func @transform_1(%arg0: i32, %arg1: i32) -> (i32, i32) {
    %c0_i32 = arith.constant 0 : i32
    %c0_i32_0 = arith.constant 0 : i32
    return %arg0, %c0_i32 : i32, i32
  }
  func.func @transform_2(%arg0: i32, %arg1: i32) -> (i32, i32) {
    %c0_i32 = arith.constant 0 : i32
    %c0_i32_0 = arith.constant 0 : i32
    return %arg0, %c0_i32 : i32, i32
  }
  func.func @transform_3(%arg0: i32, %arg1: i32) -> (i32, i32) {
    %c0_i32 = arith.constant 0 : i32
    return %arg0, %arg1 : i32, i32
  }
}

</mosaic_0001>

<bundles_post_ra>
// kernel: tpu_custom_call.1
= control target key start
LH: loop header
LB: loop body
LE: loop exit
PB: predicated region body
PF: predicated region fallthrough
CT: control target
= control target key end

     0   :  { %v76_v1 = vmov 0   ;;  %s122_s0 = inlined_call_operand.vmem [shape: f32[6,256], index: 0, kind: input, shape index: {}]   ;;  %s123_s1 = inlined_call_operand.vmem [shape: f32[6,1], index: 1, kind: input, shape index: {}]   ;;  %s124_s2 = inlined_call_operand.vmem [shape: f32[6,1], index: 2, kind: input, shape index: {}]   ;;  %s125_s3 = inlined_call_operand.hbm [shape: f32[6,256], index: 3, kind: output, shape index: {}]  }
   0x1   :  { %v17_v0 = vld [vmem:[%s123_s1] sm:$0x3f]  ;;  %51 = vset.pattern.permute.xlu0 %v76_v1 }
   0x2   :  { %8 = vsyncpa [#allocation3], 0  ;;  %20 = vperm.xlu0 %51, %v17_v0   ;;  %v25_v2 = vld [vmem:[%s124_s2] sm:$0x3f]  ;;  %v16_v5 = vld [vmem:[%s122_s0 + $0x8] sm:$0x3f] }
   0x3   :  { %v15_v4 = vld [vmem:[%s122_s0] sm:$0x3f]  ;;  %s77_s20 = smov [#allocation2]  }
   0x4   :  { %s41_s1 = sshll.u32 %s77_s20, 4  ;;  %s42_s1 = int_to_ptr.vmem [resolvable:$true] %s41_s1 }
   0x5   :  { %s52_s2 = scalar_lea.vmem %s42_s1, 256  ;;  %p57_p1 = scmp.lt.s32.totalorder %s42_s1, %s42_s1 }
   0x6   :  { %28 = vperm.xlu0 %51, %v25_v2   ;;  %p53_p0 = scmp.ne.s32.totalorder %s42_s1, %s52_s2  ;;  %p58_p2 = scmp.lt.s32.totalorder %s52_s2, %s52_s2 }
   0x8   :  { %p59_p3 = por %p58_p2, %p57_p1 }
   0xa   :  { %p60_p4 = pnand %p59_p3, %p53_p0 }
  0x81   :  { %v21_v3 = vpop.permute.xlu0 %20 }
  0x82   :  { %v23_v6 = vmul.f32 %v21_v3, %v15_v4  ;;  %v24_v7 = vmul.f32 %v21_v3, %v16_v5 }
  0x85   :  { %v29_v8 = vpop.permute.xlu0 %28 }
  0x86   :  { %v31_v9 = vadd.f32 %v29_v8, %v23_v6  ;;  %v32_v10 = vadd.f32 %v29_v8, %v24_v7 }
  0x88   :  { %33 = vst [vmem:[#allocation2] sm:$0x3f] %v31_v9  ;;  %34 = vst [vmem:[#allocation2 + $0x8] sm:$0x3f] %v32_v10 }
  0x89   :  { %63 = shalt.err (!%p60_p4)
}
  0x8a   :  { %s64_s0 = scalar_lea.hbm %s125_s3, 256 }
  0x8b   :  { %p65_p5 = scmp.ne.s32.totalorder %s125_s3, %s64_s0  ;;  %p68_p6 = scmp.lt.u32.totalorder %s64_s0, %s125_s3 }
  0x8d   :  { %p70_p7 = pnand %p68_p6, %p65_p5 }
  0x8f   :  { %73 = shalt.err (!%p70_p7)
}
  0x90   :  { %44 = dma.vmem_to_hbm [thread:$0]  %s42_s1, 256, %s125_s3, [#allocation3]  }
  0x91   :  { %74 = dma.done.wait [#allocation3], 256  }
  0x92   :  { %75 = vsyncadd [#allocation3], 4294967040 }
  0x93   :  { %48 = vsyncpa [#allocation3], 1 }

</bundles_post_ra>
